<compile_context>
chip_gen: v7x
topology: tpu7x:2x2x1
jax: 0.10.0
libtpu: 0.0.40
codegen_flags: <defaults>
</compile_context>

<pallas_src>
import functools

import jax
import jax.numpy as jnp
from jax.experimental import pallas as pl
from jax.experimental.pallas import tpu as pltpu

LANE = 128   # lane width
SUB = 8      # f32 sublane granule


def _round_up(x, m):
    return (x + m - 1) // m * m


def _cdiv(a, b):
    return -(-a // b)


def mlp_kernel(x_ref, w1t_ref, b1_ref, w2t_ref, b2_ref, o_ref):
    # fc1: h_t = w1^T . x^T  -- contract the feature axis of both operands
    # (A.B^T form, MXU-native).  x_ref: (TB, F), w1t_ref: (Hp, F) -> (Hp, TB).
    h = jax.lax.dot_general(
        w1t_ref[...], x_ref[...],
        dimension_numbers=(((1,), (1,)), ((), ())),
        preferred_element_type=jnp.float32)
    h = jnp.maximum(h + b1_ref[...], 0.0)           # bias + ReLU on the VPU
    # fc2: out_t = w2^T . h_t -> (Cp, TB); the store is lane-dense (TB%128==0).
    out = jnp.dot(w2t_ref[...], h.astype(w2t_ref.dtype),
                  preferred_element_type=jnp.float32)
    o_ref[...] = (out + b2_ref[...]).astype(o_ref.dtype)


def pack_params(w1, b1, w2, b2, compute_dtype=jnp.float32):
    """Transpose + zero-pad weights to sublane-friendly shapes.

    Returns:
      w1t: (Hp, F)  = w1^T zero-padded, Hp = round_up(H, 8)
      b1p: (Hp, 1)  f32
      w2t: (Cp, Hp) = w2^T zero-padded, Cp = round_up(C, 8)
      b2p: (Cp, 1)  f32
    Biases stay f32: they are added to the f32 accumulator inside the kernel.
    """
    F, H = w1.shape
    C = w2.shape[1]
    Hp = _round_up(H, SUB)
    Cp = _round_up(C, SUB)
    w1t = jnp.zeros((Hp, F), compute_dtype).at[:H, :].set(w1.T.astype(compute_dtype))
    b1p = jnp.zeros((Hp, 1), jnp.float32).at[:H, 0].set(b1.astype(jnp.float32))
    w2t = jnp.zeros((Cp, Hp), compute_dtype).at[:C, :H].set(w2.T.astype(compute_dtype))
    b2p = jnp.zeros((Cp, 1), jnp.float32).at[:C, 0].set(b2.astype(jnp.float32))
    return w1t, b1p, w2t, b2p


def net_forward_packed(x, w1t, b1p, w2t, b2p, n_classes, block_cols=4096):
    """Run the 2-layer MLP on pre-packed params.  Returns (B, n_classes)."""
    B, F = x.shape
    Hp, F_w = w1t.shape
    Cp = w2t.shape[0]
    assert F_w == F
    compute_dtype = w1t.dtype

    # ---- batch tiling ------------------------------------------------------
    # Batch rides the lane axis of the output, so the tile must be a multiple
    # of 128.  Use big balanced tiles; split into >=2 tiles (one per v7x
    # TensorCore) whenever the extra lane padding that causes is small.
    n_tiles = _cdiv(B, block_cols)
    if n_tiles == 1 and B > LANE:
        tb2 = _round_up(_cdiv(B, 2), LANE)
        if 2 * tb2 - B <= max(B // 8, LANE - 1):
            n_tiles = 2
    TB = _round_up(_cdiv(B, n_tiles), LANE)
    n_tiles = _cdiv(B, TB)
    B_pad = n_tiles * TB

    # x is passed through untouched when possible; only pad dead batch rows
    # (and cast) when needed.  No bias-column augmentation, no host transpose.
    x_in = x.astype(compute_dtype)
    if B_pad != B:
        x_in = jnp.pad(x_in, ((0, B_pad - B), (0, 0)))

    out_t = pl.pallas_call(
        mlp_kernel,
        out_shape=jax.ShapeDtypeStruct((Cp, B_pad), compute_dtype),
        grid=(n_tiles,),
        in_specs=[
            pl.BlockSpec((TB, F), lambda i: (i, 0)),    # x: streams with batch
            pl.BlockSpec((Hp, F), lambda i: (0, 0)),    # w1^T: VMEM-resident
            pl.BlockSpec((Hp, 1), lambda i: (0, 0)),    # b1:   VMEM-resident
            pl.BlockSpec((Cp, Hp), lambda i: (0, 0)),   # w2^T: VMEM-resident
            pl.BlockSpec((Cp, 1), lambda i: (0, 0)),    # b2:   VMEM-resident
        ],
        out_specs=pl.BlockSpec((Cp, TB), lambda i: (0, i)),   # lane-dense store
        compiler_params=pltpu.CompilerParams(
            dimension_semantics=("parallel",)),               # v7x: 2 TCs
    )(x_in, w1t, b1p, w2t, b2p)

    # Small (Cp, B_pad) slab -> (B, n_classes), matching the PyTorch output.
    return out_t[:n_classes, :B].T.astype(x.dtype)


def net_forward(x, w1, b1, w2, b2, compute_dtype=jnp.float32, block_cols=4096):
    """Forward of PyTorch `Net`.  Weights are (in_features, out_features),
    i.e. transposed relative to torch's .weight.

    compute_dtype=jnp.bfloat16 halves the streamed bytes (inputs, weights and
    the output slab) on v5e / v6e / v7x; accumulation stays f32 on the MXU.
    """
    packed = pack_params(w1, b1, w2, b2, compute_dtype)
    return net_forward_packed(x, *packed, n_classes=w2.shape[1],
                              block_cols=block_cols)


def init_params(key, num_size, n_classes):
    """Deterministic init mirroring nn.Linear's U(-1/sqrt(fan_in), 1/sqrt(fan_in))."""
    k1, k2, k3, k4 = jax.random.split(key, 4)
    bound1 = 1.0 / (num_size ** 0.5)
    w1 = jax.random.uniform(k1, (num_size, 50), jnp.float32, -bound1, bound1)
    b1 = jax.random.uniform(k2, (50,), jnp.float32, -bound1, bound1)
    bound2 = 1.0 / (50 ** 0.5)
    w2 = jax.random.uniform(k3, (50, n_classes), jnp.float32, -bound2, bound2)
    b2 = jax.random.uniform(k4, (n_classes,), jnp.float32, -bound2, bound2)
    return w1, b1, w2, b2


if __name__ == "__main__":
    num_size = 32
    n_classes = 10

    key = jax.random.PRNGKey(0)
    kx, kp, kx2 = jax.random.split(key, 3)
    w1, b1, w2, b2 = init_params(kp, num_size, n_classes)

    def ref_fwd(xx):
        return jnp.maximum(xx @ w1 + b1, 0.0) @ w2 + b2

    fwd = jax.jit(net_forward)

    # 1) tiny batch, f32, single tile
    x = jax.random.normal(kx, (8, num_size), jnp.float32)
    out = jax.block_until_ready(fwd(x, w1, b1, w2, b2))
    ref = ref_fwd(x)
    assert out.shape == (8, n_classes)
    assert jnp.allclose(out, ref, atol=1e-4, rtol=1e-4), \
        float(jnp.max(jnp.abs(out - ref)))

    # 2) batch that is not a tile multiple -> padded rows + 2-tile grid
    x2 = jax.random.normal(kx2, (250, num_size), jnp.float32)
    out2 = jax.block_until_ready(fwd(x2, w1, b1, w2, b2))
    ref2 = ref_fwd(x2)
    assert out2.shape == (250, n_classes)
    assert jnp.allclose(out2, ref2, atol=1e-4, rtol=1e-4), \
        float(jnp.max(jnp.abs(out2 - ref2)))

    # 3) bf16 streaming path (f32 accumulation) — loose tolerance vs f32 ref
    fwd_bf16 = jax.jit(functools.partial(net_forward, compute_dtype=jnp.bfloat16))
    out3 = jax.block_until_ready(fwd_bf16(x2, w1, b1, w2, b2))
    assert out3.shape == (250, n_classes)
    assert jnp.allclose(out3, ref2, atol=1e-1, rtol=1e-1), \
        float(jnp.max(jnp.abs(out3 - ref2)))

    print("KERNEL_OK")
</pallas_src>

<mosaic_0001>
module attributes {stable_mosaic.version = 11 : i64} {
  func.func @mlp_kernel(%arg0: i32, %arg1: memref<128x32xf32, #tpu.memory_space<vmem>>, %arg2: memref<56x32xf32, #tpu.memory_space<vmem>>, %arg3: memref<56x1xf32, #tpu.memory_space<vmem>>, %arg4: memref<16x56xf32, #tpu.memory_space<vmem>>, %arg5: memref<16x1xf32, #tpu.memory_space<vmem>>, %arg6: memref<16x128xf32, #tpu.memory_space<vmem>>) attributes {dimension_semantics = [#tpu.dimension_semantics<parallel>], iteration_bounds = array<i64: 1>, scalar_prefetch = 0 : i64, scratch_operands = 0 : i64, tpu.core_type = #tpu.core_type<tc>, window_params = [{transform_indices = @transform_0, window_bounds = array<i64: 128, 32>}, {pipeline_mode = #tpu.pipeline_mode<synchronous>, transform_indices = @transform_1, window_bounds = array<i64: 56, 32>}, {pipeline_mode = #tpu.pipeline_mode<synchronous>, transform_indices = @transform_2, window_bounds = array<i64: 56, 1>}, {pipeline_mode = #tpu.pipeline_mode<synchronous>, transform_indices = @transform_3, window_bounds = array<i64: 16, 56>}, {pipeline_mode = #tpu.pipeline_mode<synchronous>, transform_indices = @transform_4, window_bounds = array<i64: 16, 1>}, {transform_indices = @transform_5, window_bounds = array<i64: 16, 128>}]} {
    %c0 = arith.constant 0 : index
    %c0_0 = arith.constant 0 : index
    %0 = vector.load %arg2[%c0, %c0_0] : memref<56x32xf32, #tpu.memory_space<vmem>>, vector<56x32xf32>
    %c0_1 = arith.constant 0 : index
    %c0_2 = arith.constant 0 : index
    %1 = vector.load %arg1[%c0_1, %c0_2] : memref<128x32xf32, #tpu.memory_space<vmem>>, vector<128x32xf32>
    %cst = arith.constant dense<0.000000e+00> : vector<56x128xf32>
    %2 = tpu.matmul %0, %1, %cst {dimension_numbers = #tpu.dot_dimension_numbers<[1], [1], [0], [0], [0, 0, 1, 0], [], []>} : vector<56x32xf32>, vector<128x32xf32>, vector<56x128xf32> -> vector<56x128xf32>
    %c0_3 = arith.constant 0 : index
    %c0_4 = arith.constant 0 : index
    %3 = vector.load %arg3[%c0_3, %c0_4] : memref<56x1xf32, #tpu.memory_space<vmem>>, vector<56x1xf32>
    %4 = vector.broadcast %3 : vector<56x1xf32> to vector<56x128xf32>
    %5 = arith.addf %2, %4 : vector<56x128xf32>
    %cst_5 = arith.constant 0.000000e+00 : f32
    %6 = vector.broadcast %cst_5 : f32 to vector<56x128xf32>
    %7 = arith.maximumf %5, %6 : vector<56x128xf32>
    %c0_6 = arith.constant 0 : index
    %c0_7 = arith.constant 0 : index
    %8 = vector.load %arg4[%c0_6, %c0_7] : memref<16x56xf32, #tpu.memory_space<vmem>>, vector<16x56xf32>
    %cst_8 = arith.constant dense<0.000000e+00> : vector<16x128xf32>
    %9 = tpu.matmul %8, %7, %cst_8 {dimension_numbers = #tpu.dot_dimension_numbers<[1], [0], [0], [1], [0, 0, 1, 1], [], []>} : vector<16x56xf32>, vector<56x128xf32>, vector<16x128xf32> -> vector<16x128xf32>
    %c0_9 = arith.constant 0 : index
    %c0_10 = arith.constant 0 : index
    %10 = vector.load %arg5[%c0_9, %c0_10] : memref<16x1xf32, #tpu.memory_space<vmem>>, vector<16x1xf32>
    %11 = vector.broadcast %10 : vector<16x1xf32> to vector<16x128xf32>
    %12 = arith.addf %9, %11 : vector<16x128xf32>
    %c0_11 = arith.constant 0 : index
    %c0_12 = arith.constant 0 : index
    %13 = vector.load %arg6[%c0_11, %c0_12] : memref<16x128xf32, #tpu.memory_space<vmem>>, vector<16x128xf32>
    tpu.vector_store %arg6[%c0_11, %c0_12], %12 {strides = array<i32>} : memref<16x128xf32, #tpu.memory_space<vmem>>, vector<16x128xf32>,
    return
  }
  func.func @transform_0(%arg0: i32) -> (i32, i32) {
    %c0_i32 = arith.constant 0 : i32
    %c0_i32_0 = arith.constant 0 : i32
    return %arg0, %c0_i32 : i32, i32
  }
  func.func @transform_1(%arg0: i32) -> (i32, i32) {
    %c0_i32 = arith.constant 0 : i32
    %c0_i32_0 = arith.constant 0 : i32
    %c0_i32_1 = arith.constant 0 : i32
    return %c0_i32, %c0_i32_0 : i32, i32
  }
  func.func @transform_2(%arg0: i32) -> (i32, i32) {
    %c0_i32 = arith.constant 0 : i32
    %c0_i32_0 = arith.constant 0 : i32
    %c0_i32_1 = arith.constant 0 : i32
    return %c0_i32, %c0_i32_0 : i32, i32
  }
  func.func @transform_3(%arg0: i32) -> (i32, i32) {
    %c0_i32 = arith.constant 0 : i32
    %c0_i32_0 = arith.constant 0 : i32
    %c0_i32_1 = arith.constant 0 : i32
    return %c0_i32, %c0_i32_0 : i32, i32
  }
  func.func @transform_4(%arg0: i32) -> (i32, i32) {
    %c0_i32 = arith.constant 0 : i32
    %c0_i32_0 = arith.constant 0 : i32
    %c0_i32_1 = arith.constant 0 : i32
    return %c0_i32, %c0_i32_0 : i32, i32
  }
  func.func @transform_5(%arg0: i32) -> (i32, i32) {
    %c0_i32 = arith.constant 0 : i32
    %c0_i32_0 = arith.constant 0 : i32
    return %c0_i32, %arg0 : i32, i32
  }
}

</mosaic_0001>

<bundles_post_ra>
// kernel: net_forward.1
= control target key start
LH: loop header
LB: loop body
LE: loop exit
PB: predicated region body
PF: predicated region fallthrough
CT: control target
= control target key end

     0   :  { %vm85_vm0 = vcmask 261120   ;;  %v541_v0 = vmov 0.0|0.0   ;;  %vm542_vm2 = vmmov 0   ;;  %v543_v4 = vmov 0.0   ;;  %s736_s0 = inlined_call_operand.vmem [shape: f32[128,32], index: 0, kind: input, shape index: {}]   ;;  %s737_s2 = inlined_call_operand.vmem [shape: f32[56,1], index: 2, kind: input, shape index: {}]   ;;  %s738_s4 = inlined_call_operand.vmem [shape: f32[16,1], index: 4, kind: input, shape index: {}]   ;;  %s739_s1 = inlined_call_operand.vmem [shape: f32[56,32], index: 1, kind: input, shape index: {}]   ;;  %s740_s3 = inlined_call_operand.vmem [shape: f32[16,56], index: 3, kind: input, shape index: {}]   ;;  %s741_s5 = inlined_call_operand.vmem [shape: f32[16,128], index: 5, kind: output, shape index: {}]  }
   0x1   :  { %491 = vmatprep.subr.bf16.mxu0 %v541_v0  ;;  %v27_v1 = vld [vmem:[%s736_s0] sm:$0xff]  ;;  %v28_v2 = vld [vmem:[%s736_s0 + $0x8] sm:$0xff]  ;;  %vm584_vm1 = vmpackc.low %vm85_vm0, %vm85_vm0  ;;  %453 = vmatprep.mubr.msk.f32.mxu0 %vm542_vm2, %v543_v4  ;;  %v544_v6 = vmov 0   ;;  %vm276_vm3 = vcmask 457728  }
   0x2   :  { %v492_v5 = vpack.c.bf16 %v28_v2, %v27_v1  ;;  %539 = vset.pattern.permute.xlu0 %v544_v6  ;;  %540 = vset.pattern.permute.xlu1 %v544_v6  ;;  %v29_v7 = vld [vmem:[%s736_s0 + $0x10] sm:$0xff]  ;;  %v30_v8 = vld [vmem:[%s736_s0 + $0x18] sm:$0xff]  ;;  %v43_v10 = vld [vmem:[%s737_s2] sm:$0xff] }
   0x3   :  { %v496_v9 = vpack.c.bf16 %v30_v8, %v29_v7  ;;  %v45_v11 = vld [vmem:[%s737_s2 + $0x10] sm:$0xff]  ;;  %52 = vperm.xlu0 %539, %v43_v10   ;;  %v44_v12 = vld [vmem:[%s737_s2 + $0x8] sm:$0xff]  ;;  %v46_v13 = vld [vmem:[%s737_s2 + $0x18] sm:$0xff] }
   0x4   :  { %494 = vmatpush3.bf16.xpose.msk.msra.mxu0 %vm584_vm1, %v492_v5  ;;  %62 = vperm.xlu1 %540, %v45_v11   ;;  %v31_v14 = vld [vmem:[%s736_s0 + $0x20] sm:$0xff]  ;;  %v32_v15 = vld [vmem:[%s736_s0 + $0x28] sm:$0xff]  ;;  %v49_v19 = vld [vmem:[%s737_s2 + $0x30] sm:$0xff] }
   0x5   :  { %495 = vmatprep.subr.bf16.mxu0 %v541_v0  ;;  %v47_v16 = vld [vmem:[%s737_s2 + $0x20] sm:$0xff]  ;;  %v48_v17 = vld [vmem:[%s737_s2 + $0x28] sm:$0xff]  ;;  %v500_v18 = vpack.c.bf16 %v32_v15, %v31_v14  ;;  %v33_v21 = vld [vmem:[%s736_s0 + $0x30] sm:$0xff] }
   0x6   :  { %v264_v20 = vld [vmem:[%s738_s4] sm:$0xff]  ;;  %v34_v22 = vld [vmem:[%s736_s0 + $0x38] sm:$0xff]  ;;  %v265_v23 = vld [vmem:[%s738_s4 + $0x8] sm:$0xff] }
   0x7   :  { %57 = vperm.xlu0 %539, %v44_v12   ;;  %v504_v24 = vpack.c.bf16 %v34_v22, %v33_v21  ;;  %v35_v25 = vld [vmem:[%s736_s0 + $0x40] sm:$0xff]  ;;  %v36_v26 = vld [vmem:[%s736_s0 + $0x48] sm:$0xff]  ;;  %v37_v28 = vld [vmem:[%s736_s0 + $0x50] sm:$0xff] }
   0x8   :  { %67 = vperm.xlu1 %540, %v46_v13   ;;  %v508_v27 = vpack.c.bf16 %v36_v26, %v35_v25  ;;  %v38_v29 = vld [vmem:[%s736_s0 + $0x58] sm:$0xff]  ;;  %v39_v31 = vld [vmem:[%s736_s0 + $0x60] sm:$0xff]  ;;  %v40_v32 = vld [vmem:[%s736_s0 + $0x68] sm:$0xff] }
   0x9   :  { %v512_v30 = vpack.c.bf16 %v38_v29, %v37_v28  ;;  %v516_v33 = vpack.c.bf16 %v40_v32, %v39_v31  ;;  %v41_v34 = vld [vmem:[%s736_s0 + $0x70] sm:$0xff]  ;;  %v42_v35 = vld [vmem:[%s736_s0 + $0x78] sm:$0xff]  ;;  %v20_v37 = vld [vmem:[%s739_s1] sm:$0xff] }
   0xa   :  { %v520_v36 = vpack.c.bf16 %v42_v35, %v41_v34  ;;  %v21_v38 = vld [vmem:[%s739_s1 + $0x8] sm:$0xff]  ;;  %v22_v39 = vld [vmem:[%s739_s1 + $0x10] sm:$0xff]  ;;  %v23_v40 = vld [vmem:[%s739_s1 + $0x18] sm:$0xff] }
   0xb   :  { %72 = vperm.xlu0 %539, %v47_v16   ;;  %v24_v41 = vld [vmem:[%s739_s1 + $0x20] sm:$0xff]  ;;  %v25_v42 = vld [vmem:[%s739_s1 + $0x28] sm:$0xff]  ;;  %v26_v43 = vld [vmem:[%s739_s1 + $0x30] sm:$0xff] }
   0xc   :  { %498 = vmatpush3.bf16.xpose.msk.msra.mxu0 %vm584_vm1, %v496_v9  ;;  %77 = vperm.xlu1 %540, %v48_v17   ;;  %v262_v44 = vld [vmem:[%s740_s3] sm:$0xff] }
   0xd   :  { %499 = vmatprep.subr.bf16.mxu0 %v541_v0  ;;  %488 = vmatprep.mubr.msk.f32.mxu1 %vm276_vm3, %v262_v44 }
   0xf   :  { %82 = vperm.xlu0 %539, %v49_v19   ;;  %v263_v19 = vld [vmem:[%s740_s3 + $0x8] sm:$0xff] }
  0x10   :  { %268 = vperm.xlu1 %540, %v264_v20  }
  0x13   :  { %273 = vperm.xlu0 %539, %v265_v23  }
  0x14   :  { %502 = vmatpush3.bf16.xpose.msk.msra.mxu0 %vm584_vm1, %v500_v18 }
  0x15   :  { %503 = vmatprep.subr.bf16.mxu0 %v541_v0 }
  0x1c   :  { %506 = vmatpush3.bf16.xpose.msk.msra.mxu0 %vm584_vm1, %v504_v24 }
  0x1d   :  { %507 = vmatprep.subr.bf16.mxu0 %v541_v0 }
  0x24   :  { %510 = vmatpush3.bf16.xpose.msk.msra.mxu0 %vm584_vm1, %v508_v27 }
  0x25   :  { %511 = vmatprep.subr.bf16.mxu0 %v541_v0 }
  0x2c   :  { %514 = vmatpush3.bf16.xpose.msk.msra.mxu0 %vm584_vm1, %v512_v30 }
  0x2d   :  { %515 = vmatprep.subr.bf16.mxu0 %v541_v0 }
  0x34   :  { %518 = vmatpush3.bf16.xpose.msk.msra.mxu0 %vm584_vm1, %v516_v33 }
  0x35   :  { %519 = vmatprep.subr.bf16.mxu0 %v541_v0 }
  0x3c   :  { %522 = vmatpush3.bf16.xpose.msk.msra.mxu0 %vm584_vm1, %v520_v36 }
  0x43   :  { %454 = vmatmul.mubr.msk.f32.vlgmr.msra.gmra.mrb[0].mxu0 %vm85_vm0, %v20_v37 }
  0x44   :  { %456 = vmatprep.mubr.msk.f32.mxu0 %vm542_vm2, %v543_v4 }
  0x47   :  { %457 = vmatmul.mubr.msk.f32.gmra.mrb[2].mxu0 %vm85_vm0, %v21_v38 }
  0x48   :  { %459 = vmatprep.mubr.msk.f32.mxu0 %vm542_vm2, %v543_v4 }
  0x4b   :  { %460 = vmatmul.mubr.msk.f32.gmra.mrb[4].mxu0 %vm85_vm0, %v22_v39 }
  0x4c   :  { %462 = vmatprep.mubr.msk.f32.mxu0 %vm542_vm2, %v543_v4 }
  0x4f   :  { %463 = vmatmul.mubr.msk.f32.gmra.mrb[6].mxu0 %vm85_vm0, %v23_v40 }
  0x50   :  { %465 = vmatprep.mubr.msk.f32.mxu0 %vm542_vm2, %v543_v4 }
  0x53   :  { %466 = vmatmul.mubr.msk.f32.gmra.mrb[8].mxu0 %vm85_vm0, %v24_v41 }
  0x54   :  { %468 = vmatprep.mubr.msk.f32.mxu0 %vm542_vm2, %v543_v4 }
  0x57   :  { %469 = vmatmul.mubr.msk.f32.gmra.mrb[10].mxu0 %vm85_vm0, %v25_v42 }
  0x58   :  { %471 = vmatprep.mubr.msk.f32.mxu0 %vm542_vm2, %v543_v4 }
  0x5b   :  { %472 = vmatmul.mubr.msk.f32.gmra.mrb[12].mxu0 %vm85_vm0, %v26_v43 }
  0x82   :  { %v53_v45 = vpop.permute.xlu0 %52 }
  0x83   :  { %v63_v53 = vpop.permute.xlu1 %62 }
  0x86   :  { %v58_v49 = vpop.permute.xlu0 %57 }
  0x87   :  { %v68_v60 = vpop.permute.xlu1 %67 }
  0x8a   :  { %v73_v5 = vpop.permute.xlu0 %72 }
  0x8b   :  { %v78_v7 = vpop.permute.xlu1 %77 }
  0x8e   :  { %v83_v13 = vpop.permute.xlu0 %82 }
  0x8f   :  { %v269_v22 = vpop.permute.xlu1 %268 }
  0x92   :  { %v274_v20 = vpop.permute.xlu0 %273 }
 0x116   :  { %v221_v46 = vpop.f32.mrb[0].mxu0 }
 0x117   :  { %v455_v47 = vpop.f32.mrb[1].mxu0  ;;  %v222_v48 = vadd.f32 %v221_v46, %v53_v45 }
 0x119   :  { %v255_v54 = vmax.f32 %v222_v48, 0.0 }
 0x11a   :  { %v226_v50 = vpop.f32.mrb[2].mxu0 }
 0x11b   :  { %v227_v51 = vadd.f32 %v226_v50, %v58_v49  ;;  %v458_v52 = vpop.f32.mrb[3].mxu0 }
 0x11d   :  { %v256_v55 = vmax.f32 %v227_v51, 0.0 }
 0x11e   :  { %v231_v56 = vpop.f32.mrb[4].mxu0 }
 0x11f   :  { %v461_v57 = vpop.f32.mrb[5].mxu0  ;;  %v523_v58 = vpack.c.bf16 %v256_v55, %v255_v54  ;;  %v232_v59 = vadd.f32 %v231_v56, %v63_v53 }
 0x121   :  { %524 = vmatprep.subr.bf16.mxu1 %v523_v58  ;;  %v257_v0 = vmax.f32 %v232_v59, 0.0 }
 0x122   :  { %v236_v61 = vpop.f32.mrb[6].mxu0  ;;  %526 = vmatpush3.bf16.msra.mxu1 %v523_v58 }
 0x123   :  { %v237_v62 = vadd.f32 %v236_v61, %v68_v60  ;;  %v464_v63 = vpop.f32.mrb[7].mxu0 }
 0x125   :  { %v258_v1 = vmax.f32 %v237_v62, 0.0 }
 0x126   :  { %v241_v2 = vpop.f32.mrb[8].mxu0 }
 0x127   :  { %v527_v3 = vpack.c.bf16 %v258_v1, %v257_v0  ;;  %v467_v4 = vpop.f32.mrb[9].mxu0  ;;  %v242_v6 = vadd.f32 %v241_v2, %v73_v5 }
 0x129   :  { %528 = vmatprep.subr.bf16.mxu1 %v527_v3  ;;  %v259_v11 = vmax.f32 %v242_v6, 0.0 }
 0x12a   :  { %v246_v8 = vpop.f32.mrb[10].mxu0  ;;  %530 = vmatpush3.bf16.msra.mxu1 %v527_v3 }
 0x12b   :  { %v247_v9 = vadd.f32 %v246_v8, %v78_v7  ;;  %v470_v10 = vpop.f32.mrb[11].mxu0 }
 0x12d   :  { %v260_v12 = vmax.f32 %v247_v9, 0.0 }
 0x12e   :  { %v251_v14 = vpop.f32.mrb[12].mxu0 }
 0x12f   :  { %v531_v15 = vpack.c.bf16 %v260_v12, %v259_v11  ;;  %v252_v16 = vadd.f32 %v251_v14, %v83_v13  ;;  %v473_v17 = vpop.f32.mrb[13].mxu0 }
 0x131   :  { %v261_v18 = vmax.f32 %v252_v16, 0.0  ;;  %532 = vmatprep.subr.bf16.mxu1 %v531_v15 }
 0x132   :  { %534 = vmatpush3.bf16.msra.mxu1 %v531_v15 }
 0x133   :  { %486 = vmatprep.subr.mxu1 %v261_v18 }
 0x136   :  { %487 = vmatpush3.msra.mxu1 %v261_v18 }
 0x137   :  { %489 = vmatmul.mubr.msk.f32.vlgmr.msra.gmra.mrb[0].mxu1 %vm276_vm3, %v263_v19 }
 0x20a   :  { %v490_v21 = vpop.f32.mrb[0].mxu1 }
 0x20b   :  { %v355_v23 = vadd.f32 %v490_v21, %v274_v20  ;;  %v349_v24 = vpop.f32.mrb[1].mxu1 }
 0x20c   :  { %v350_v25 = vadd.f32 %v349_v24, %v269_v22 }
 0x20d   :  { %359 = vst [vmem:[%s741_s5 + $0x8] sm:$0xff] %v355_v23 }
 0x20e   :  { %358 = vst [vmem:[%s741_s5] sm:$0xff] %v350_v25 }

</bundles_post_ra>
